<compile_context>
chip_gen: v7x
topology: tpu7x:2x2x1
jax: 0.10.0
libtpu: 0.0.40
codegen_flags: <defaults>
</compile_context>

<pallas_src>
import jax
import jax.numpy as jnp
from jax.experimental import pallas as pl
from jax.experimental.pallas import tpu as pltpu


def _round_up(x, m):
    return ((x + m - 1) // m) * m


def gated_dense_kernel(x_ref, wf_ref, bf_ref, o_ref, acc_ref):
    """One (tile_m, tile_n) output block; K is the innermost reduction axis.

    wf_ref holds [Wh_tile | Wg_tile] side by side -> one MXU matmul yields a
    (tile_m, 2*tile_n) slab whose halves are h and g for this output tile.
    """
    k = pl.program_id(2)

    @pl.when(k == 0)
    def _():
        acc_ref[...] = jnp.zeros_like(acc_ref)

    acc_ref[...] += jnp.dot(
        x_ref[...], wf_ref[...], preferred_element_type=jnp.float32
    )

    @pl.when(k == pl.num_programs(2) - 1)
    def _():
        tn = o_ref.shape[1]
        acc = acc_ref[...] + bf_ref[...].astype(jnp.float32)  # (tile_m, 2*tile_n)
        h = acc[:, :tn]          # lane-aligned slice (tn is a multiple of 128)
        g = acc[:, tn:]
        o_ref[...] = (h * jax.nn.sigmoid(g)).astype(o_ref.dtype)


def gated_dense(x, wh_t, bh, wg_t, bg, *, tile_m=256, tile_n=512, tile_k=512):
    """Compute (x @ Wh^T + bh) * sigmoid(x @ Wg^T + bg).

    x:            (M, K)
    wh_t, wg_t:   (K, N)   (already transposed vs. PyTorch's (N, K) storage)
    bh, bg:       (N,) or (1, N)
    returns:      (M, N) in x.dtype
    """
    M, K = x.shape
    Kw, N = wh_t.shape
    assert Kw == K and wg_t.shape == (K, N)

    # Clamp tiles to the (rounded-up) problem sizes; keep TPU-native granules.
    tile_m = min(tile_m, _round_up(M, 8))      # multiple of 8 (sublane)
    tile_n = min(tile_n, _round_up(N, 128))    # multiple of 128 (lane)
    tile_k = min(tile_k, _round_up(K, 128))    # multiple of 128 (MXU depth)

    Mp = _round_up(M, tile_m)
    Np = _round_up(N, tile_n)
    Kp = _round_up(K, tile_k)
    n_tiles_m = Mp // tile_m
    n_tiles_n = Np // tile_n
    n_tiles_k = Kp // tile_k

    # Zero-pad to tile multiples (padded K contributes 0 to the dot product).
    xp = jnp.pad(x, ((0, Mp - M), (0, Kp - K)))
    whp = jnp.pad(wh_t, ((0, Kp - K), (0, Np - N)))
    wgp = jnp.pad(wg_t, ((0, Kp - K), (0, Np - N)))
    bhp = jnp.pad(jnp.reshape(bh, (1, N)), ((0, 0), (0, Np - N)))
    bgp = jnp.pad(jnp.reshape(bg, (1, N)), ((0, 0), (0, Np - N)))

    # Tile-interleave Wh / Wg along the output axis so each N-tile's h- and
    # g-columns are adjacent: wf[:, j*2tn : j*2tn+tn] = Wh tile j, next tn = Wg.
    wf = jnp.stack(
        [whp.reshape(Kp, n_tiles_n, tile_n), wgp.reshape(Kp, n_tiles_n, tile_n)],
        axis=2,
    ).reshape(Kp, 2 * Np).astype(x.dtype)
    bf = jnp.stack(
        [bhp.reshape(1, n_tiles_n, tile_n), bgp.reshape(1, n_tiles_n, tile_n)],
        axis=2,
    ).reshape(1, 2 * Np).astype(jnp.float32)

    grid = (n_tiles_m, n_tiles_n, n_tiles_k)

    out_padded = pl.pallas_call(
        gated_dense_kernel,
        out_shape=jax.ShapeDtypeStruct((Mp, Np), x.dtype),
        grid_spec=pltpu.PrefetchScalarGridSpec(
            num_scalar_prefetch=0,
            grid=grid,
            in_specs=[
                pl.BlockSpec((tile_m, tile_k), lambda i, j, k: (i, k)),       # x
                pl.BlockSpec((tile_k, 2 * tile_n), lambda i, j, k: (k, j)),   # [Wh|Wg]
                pl.BlockSpec((1, 2 * tile_n), lambda i, j, k: (0, j)),        # [bh|bg]
            ],
            out_specs=pl.BlockSpec((tile_m, tile_n), lambda i, j, k: (i, j)),
            scratch_shapes=[pltpu.VMEM((tile_m, 2 * tile_n), jnp.float32)],
        ),
        compiler_params=pltpu.CompilerParams(
            dimension_semantics=("parallel", "parallel", "arbitrary")
        ),
    )(xp, wf, bf)

    return out_padded[:M, :N]


def init_linear_params(key, in_dim, out_dim):
    """Deterministic init mimicking PyTorch nn.Linear (uniform +/- 1/sqrt(in_dim))."""
    k_w, k_b = jax.random.split(key)
    bound = 1.0 / (in_dim ** 0.5)
    # PyTorch stores weight as (out_dim, in_dim); we keep the transposed (in_dim, out_dim).
    w_t = jax.random.uniform(k_w, (in_dim, out_dim), jnp.float32, -bound, bound)
    b = jax.random.uniform(k_b, (1, out_dim), jnp.float32, -bound, bound)
    return w_t, b


if __name__ == "__main__":
    key = jax.random.PRNGKey(0)

    # Two small configs: an aligned one and one that exercises the padding path.
    configs = [
        (16, 64, 128),   # batch, in_dim, out_dim (aligned)
        (10, 48, 96),    # ragged batch / K / N -> zero-padding path
    ]

    for batch, in_dim, out_dim in configs:
        key, k_x, k_h, k_g = jax.random.split(key, 4)
        x = jax.random.normal(k_x, (batch, in_dim), jnp.float32)
        wh_t, bh = init_linear_params(k_h, in_dim, out_dim)
        wg_t, bg = init_linear_params(k_g, in_dim, out_dim)

        out = gated_dense(x, wh_t, bh, wg_t, bg)
        out = jax.block_until_ready(out)

        # Reference (same math as the PyTorch forward).
        ref = (x @ wh_t + bh) * jax.nn.sigmoid(x @ wg_t + bg)
        assert out.shape == ref.shape, (out.shape, ref.shape)
        assert jnp.allclose(out, ref, atol=1e-5, rtol=1e-5), (
            f"mismatch vs reference for shape {(batch, in_dim, out_dim)}"
        )

    print("KERNEL_OK")
</pallas_src>

<mosaic_0001>
module attributes {stable_mosaic.version = 11 : i64} {
  func.func @gated_dense_kernel(%arg0: i32, %arg1: i32, %arg2: i32, %arg3: memref<16x128xf32, #tpu.memory_space<vmem>>, %arg4: memref<128x256xf32, #tpu.memory_space<vmem>>, %arg5: memref<1x256xf32, #tpu.memory_space<vmem>>, %arg6: memref<16x128xf32, #tpu.memory_space<vmem>>, %arg7: memref<16x256xf32, #tpu.memory_space<vmem>>) attributes {dimension_semantics = [#tpu.dimension_semantics<parallel>, #tpu.dimension_semantics<parallel>, #tpu.dimension_semantics<arbitrary>], iteration_bounds = array<i64: 1, 1, 1>, scalar_prefetch = 0 : i64, scratch_operands = 1 : i64, tpu.core_type = #tpu.core_type<tc>, window_params = [{transform_indices = @transform_0, window_bounds = array<i64: 16, 128>}, {transform_indices = @transform_1, window_bounds = array<i64: 128, 256>}, {transform_indices = @transform_2, window_bounds = array<i64: 1, 256>}, {transform_indices = @transform_3, window_bounds = array<i64: 16, 128>}]} {
    %c0_i32 = arith.constant 0 : i32
    %0 = arith.cmpi eq, %arg2, %c0_i32 : i32
    %1 = arith.extui %0 : i1 to i32
    %c0_i32_0 = arith.constant 0 : i32
    %2 = arith.cmpi ne, %1, %c0_i32_0 : i32
    scf.if %2 {
      %cst_10 = arith.constant 0.000000e+00 : f32
      %12 = vector.broadcast %cst_10 : f32 to vector<16x256xf32>
      %c0_11 = arith.constant 0 : index
      %c0_12 = arith.constant 0 : index
      %13 = vector.load %arg7[%c0_11, %c0_12] : memref<16x256xf32, #tpu.memory_space<vmem>>, vector<16x256xf32>
      tpu.vector_store %arg7[%c0_11, %c0_12], %12 {strides = array<i32>} : memref<16x256xf32, #tpu.memory_space<vmem>>, vector<16x256xf32>,
    } else {
    }
    %c0 = arith.constant 0 : index
    %c0_1 = arith.constant 0 : index
    %3 = vector.load %arg7[%c0, %c0_1] : memref<16x256xf32, #tpu.memory_space<vmem>>, vector<16x256xf32>
    %c0_2 = arith.constant 0 : index
    %c0_3 = arith.constant 0 : index
    %4 = vector.load %arg3[%c0_2, %c0_3] : memref<16x128xf32, #tpu.memory_space<vmem>>, vector<16x128xf32>
    %c0_4 = arith.constant 0 : index
    %c0_5 = arith.constant 0 : index
    %5 = vector.load %arg4[%c0_4, %c0_5] : memref<128x256xf32, #tpu.memory_space<vmem>>, vector<128x256xf32>
    %cst = arith.constant dense<0.000000e+00> : vector<16x256xf32>
    %6 = tpu.matmul %4, %5, %cst {dimension_numbers = #tpu.dot_dimension_numbers<[1], [0], [0], [1], [0, 0, 1, 1], [], []>} : vector<16x128xf32>, vector<128x256xf32>, vector<16x256xf32> -> vector<16x256xf32>
    %7 = arith.addf %3, %6 : vector<16x256xf32>
    %c0_6 = arith.constant 0 : index
    %c0_7 = arith.constant 0 : index
    %8 = vector.load %arg7[%c0_6, %c0_7] : memref<16x256xf32, #tpu.memory_space<vmem>>, vector<16x256xf32>
    tpu.vector_store %arg7[%c0_6, %c0_7], %7 {strides = array<i32>} : memref<16x256xf32, #tpu.memory_space<vmem>>, vector<16x256xf32>,
    %c0_i32_8 = arith.constant 0 : i32
    %9 = arith.cmpi eq, %arg2, %c0_i32_8 : i32
    %10 = arith.extui %9 : i1 to i32
    %c0_i32_9 = arith.constant 0 : i32
    %11 = arith.cmpi ne, %10, %c0_i32_9 : i32
    scf.if %11 {
      %c0_10 = arith.constant 0 : index
      %c0_11 = arith.constant 0 : index
      %12 = vector.load %arg7[%c0_10, %c0_11] : memref<16x256xf32, #tpu.memory_space<vmem>>, vector<16x256xf32>
      %c0_12 = arith.constant 0 : index
      %c0_13 = arith.constant 0 : index
      %13 = vector.load %arg5[%c0_12, %c0_13] : memref<1x256xf32, #tpu.memory_space<vmem>>, vector<1x256xf32>
      %14 = vector.broadcast %13 : vector<1x256xf32> to vector<16x256xf32>
      %15 = arith.addf %12, %14 : vector<16x256xf32>
      %16 = vector.extract_strided_slice %15 {offsets = [0, 0], sizes = [16, 128], strides = [1, 1]} : vector<16x256xf32> to vector<16x128xf32>
      %17 = vector.extract_strided_slice %15 {offsets = [0, 128], sizes = [16, 128], strides = [1, 1]} : vector<16x256xf32> to vector<16x128xf32>
      %18 = arith.negf %17 : vector<16x128xf32>
      %19 = math.exp %18 : vector<16x128xf32>
      %cst_14 = arith.constant 1.000000e+00 : f32
      %20 = vector.broadcast %cst_14 : f32 to vector<16x128xf32>
      %21 = arith.addf %20, %19 : vector<16x128xf32>
      %22 = arith.divf %20, %21 : vector<16x128xf32>
      %23 = arith.mulf %16, %22 : vector<16x128xf32>
      %c0_15 = arith.constant 0 : index
      %c0_16 = arith.constant 0 : index
      %24 = vector.load %arg6[%c0_15, %c0_16] : memref<16x128xf32, #tpu.memory_space<vmem>>, vector<16x128xf32>
      tpu.vector_store %arg6[%c0_15, %c0_16], %23 {strides = array<i32>} : memref<16x128xf32, #tpu.memory_space<vmem>>, vector<16x128xf32>,
    } else {
    }
    return
  }
  func.func @transform_0(%arg0: i32, %arg1: i32, %arg2: i32) -> (i32, i32) {
    %c0_i32 = arith.constant 0 : i32
    return %arg0, %arg2 : i32, i32
  }
  func.func @transform_1(%arg0: i32, %arg1: i32, %arg2: i32) -> (i32, i32) {
    %c0_i32 = arith.constant 0 : i32
    return %arg2, %arg1 : i32, i32
  }
  func.func @transform_2(%arg0: i32, %arg1: i32, %arg2: i32) -> (i32, i32) {
    %c0_i32 = arith.constant 0 : i32
    %c0_i32_0 = arith.constant 0 : i32
    return %c0_i32, %arg1 : i32, i32
  }
  func.func @transform_3(%arg0: i32, %arg1: i32, %arg2: i32) -> (i32, i32) {
    %c0_i32 = arith.constant 0 : i32
    return %arg0, %arg1 : i32, i32
  }
}

</mosaic_0001>

<bundles_post_ra>
// kernel: tpu_custom_call.1
= control target key start
LH: loop header
LB: loop body
LE: loop exit
PB: predicated region body
PF: predicated region fallthrough
CT: control target
= control target key end

     0   :  { %8 = vsyncpa [#allocation4], 0  ;;  %s442_s0 = inlined_call_operand.hbm [shape: f32[16,128], index: 0, kind: input, shape index: {}]   ;;  %s443_s1 = inlined_call_operand.hbm [shape: f32[128,256], index: 1, kind: input, shape index: {}]   ;;  %s444_s2 = inlined_call_operand.vmem [shape: f32[1,256], index: 2, kind: input, shape index: {}]   ;;  %s445_s3 = inlined_call_operand.hbm [shape: f32[16,128], index: 3, kind: output, shape index: {}]  }
   0x1   :  { %9 = vsyncpa [#allocation7], 0 }
   0x2   :  { %10 = vsyncpa [#allocation5], 0  ;;  %s369_s12 = smov [#allocation3]   ;;  %s297_s16 = scalar_lea.hbm %s442_s0, 256 }
   0x3   :  { %s16_s13 = sshll.u32 %s369_s12, 4  ;;  %p298_p0 = scmp.ne.s32.totalorder %s442_s0, %s297_s16  ;;  %s17_s13 = int_to_ptr.vmem [resolvable:$true] %s16_s13 }
   0x4   :  { %p301_p1 = scmp.lt.u32.totalorder %s297_s16, %s442_s0 }
   0x6   :  { %p303_p2 = pnand %p301_p1, %p298_p0 }
   0x8   :  { %306 = shalt.err (!%p303_p2)
}
   0x9   :  { %s307_s21 = scalar_lea.vmem %s17_s13, 256  ;;  %p312_p4 = scmp.lt.s32.totalorder %s17_s13, %s17_s13 }
   0xa   :  { %p308_p3 = scmp.ne.s32.totalorder %s17_s13, %s307_s21  ;;  %p313_p5 = scmp.lt.s32.totalorder %s307_s21, %s307_s21 }
   0xc   :  { %p314_p6 = por %p313_p5, %p312_p4 }
   0xe   :  { %p315_p7 = pnand %p314_p6, %p308_p3 }
  0x10   :  { %318 = shalt.err (!%p315_p7)
}
  0x11   :  { %s370_s22 = smov 128   ;;  %s371_s23 = smov 8  }
  0x12   :  { %22 = dma.hbm_to_vmem [thread:$0]  %s442_s0, 256, %s17_s13, [#allocation4], %s370_s22, %s370_s22, %s371_s23  }
  0x13   :  { %s372_s26 = smov [#allocation6]   ;;  %s319_s30 = scalar_lea.hbm %s443_s1, 4096 }
  0x14   :  { %s28_s27 = sshll.u32 %s372_s26, 4  ;;  %p320_p8 = scmp.ne.s32.totalorder %s443_s1, %s319_s30  ;;  %s29_s27 = int_to_ptr.vmem [resolvable:$true] %s28_s27 }
  0x15   :  { %p323_p9 = scmp.lt.u32.totalorder %s319_s30, %s443_s1 }
  0x17   :  { %p325_p10 = pnand %p323_p9, %p320_p8 }
  0x19   :  { %328 = shalt.err (!%p325_p10)
}
  0x1a   :  { %s329_s8 = scalar_lea.vmem %s29_s27, 4096  ;;  %p334_p12 = scmp.lt.s32.totalorder %s29_s27, %s29_s27 }
  0x1b   :  { %p330_p11 = scmp.ne.s32.totalorder %s29_s27, %s329_s8  ;;  %p335_p13 = scmp.lt.s32.totalorder %s329_s8, %s329_s8 }
  0x1d   :  { %p336_p0 = por %p335_p13, %p334_p12 }
  0x1f   :  { %p337_p1 = pnand %p336_p0, %p330_p11 }
  0x21   :  { %340 = shalt.err (!%p337_p1)
}
  0x22   :  { %s373_s0 = smov 256   ;;  %s374_s9 = smov 16  }
  0x23   :  { %34 = dma.hbm_to_vmem [thread:$0]  %s443_s1, 4096, %s29_s27, [#allocation7], %s373_s0, %s373_s0, %s374_s9  }
  0x24   :  { %363 = dma.done.wait [#allocation4], 256  }
  0x25   :  { %364 = vsyncadd [#allocation4], 4294967040 }
  0x26   :  { %365 = dma.done.wait [#allocation7], 4096  }
  0x27   :  { %366 = vsyncadd [#allocation7], 4294963200  ;;  %v375_v0 = vmov 0.0   ;;  %v58_v1 = vld [vmem:[#allocation6 + $0x8] sm:$0xff]  ;;  %v60_v2 = vld [vmem:[#allocation6 + $0x18] sm:$0xff]  ;;  %v183_v51 = vlaneseq }
  0x28   :  { %153 = vmatprep.mubr.f32.mxu0 %v375_v0  ;;  %159 = vmatprep.mubr.f32.mxu1 %v375_v0  ;;  %v57_v3 = vld [vmem:[#allocation6] sm:$0xff]  ;;  %v233_v4 = vpack.c.bf16 %v60_v2, %v58_v1  ;;  %v59_v5 = vld [vmem:[#allocation6 + $0x10] sm:$0xff]  ;;  %v62_v6 = vld [vmem:[#allocation6 + $0x28] sm:$0xff] }
  0x29   :  { %v64_v7 = vld [vmem:[#allocation6 + $0x38] sm:$0xff]  ;;  %v235_v8 = vpack.c.bf16 %v59_v5, %v57_v3  ;;  %v61_v10 = vld [vmem:[#allocation6 + $0x20] sm:$0xff]  ;;  %v63_v11 = vld [vmem:[#allocation6 + $0x30] sm:$0xff]  ;;  %v184_v52 = vshrl.u32 %v183_v51, 7 }
  0x2a   :  { %v237_v9 = vpack.c.bf16 %v64_v7, %v62_v6  ;;  %v66_v12 = vld [vmem:[#allocation6 + $0x48] sm:$0xff]  ;;  %234 = vmatprep.subr.bf16.mxu0 %v233_v4  ;;  %265 = vmatprep.subr.bf16.mxu1 %v233_v4  ;;  %v68_v13 = vld [vmem:[#allocation6 + $0x58] sm:$0xff]  ;;  %v239_v14 = vpack.c.bf16 %v63_v11, %v61_v10  ;;  %v65_v16 = vld [vmem:[#allocation6 + $0x40] sm:$0xff] }
  0x2b   :  { %236 = vmatpush1.bf16.msra.mxu0 %v235_v8  ;;  %273 = vmatpush1.bf16.msra.mxu1 %v235_v8  ;;  %v241_v15 = vpack.c.bf16 %v68_v13, %v66_v12  ;;  %v67_v17 = vld [vmem:[#allocation6 + $0x50] sm:$0xff]  ;;  %v70_v18 = vld [vmem:[#allocation6 + $0x68] sm:$0xff]  ;;  %v72_v19 = vld [vmem:[#allocation6 + $0x78] sm:$0xff]  ;;  %v189_v53 = vsub.s32 1, %v184_v52  ;;  %v185_v4 = vsub.s32 0, %v184_v52 }
  0x2c   :  { %238 = vmatprep.subr.bf16.mxu0 %v237_v9  ;;  %266 = vmatprep.subr.bf16.mxu1 %v237_v9  ;;  %v243_v20 = vpack.c.bf16 %v67_v17, %v65_v16  ;;  %v245_v21 = vpack.c.bf16 %v72_v19, %v70_v18  ;;  %v69_v22 = vld [vmem:[#allocation6 + $0x60] sm:$0xff]  ;;  %v71_v23 = vld [vmem:[#allocation6 + $0x70] sm:$0xff]  ;;  %v74_v24 = vld [vmem:[#allocation6 + $0x88] sm:$0xff] }
  0x2d   :  { %v76_v25 = vld [vmem:[#allocation6 + $0x98] sm:$0xff]  ;;  %v247_v26 = vpack.c.bf16 %v71_v23, %v69_v22  ;;  %v73_v28 = vld [vmem:[#allocation6 + $0x80] sm:$0xff]  ;;  %v75_v29 = vld [vmem:[#allocation6 + $0x90] sm:$0xff] }
  0x2e   :  { %v249_v27 = vpack.c.bf16 %v76_v25, %v74_v24  ;;  %v78_v30 = vld [vmem:[#allocation6 + $0xa8] sm:$0xff]  ;;  %v80_v31 = vld [vmem:[#allocation6 + $0xb8] sm:$0xff]  ;;  %v251_v32 = vpack.c.bf16 %v75_v29, %v73_v28  ;;  %v77_v34 = vld [vmem:[#allocation6 + $0xa0] sm:$0xff] }
  0x2f   :  { %240 = vmatpush1.bf16.msra.mxu0 %v239_v14  ;;  %274 = vmatpush1.bf16.msra.mxu1 %v239_v14  ;;  %v253_v33 = vpack.c.bf16 %v80_v31, %v78_v30  ;;  %v79_v35 = vld [vmem:[#allocation6 + $0xb0] sm:$0xff]  ;;  %v82_v36 = vld [vmem:[#allocation6 + $0xc8] sm:$0xff]  ;;  %v84_v37 = vld [vmem:[#allocation6 + $0xd8] sm:$0xff] }
  0x30   :  { %242 = vmatprep.subr.bf16.mxu0 %v241_v15  ;;  %267 = vmatprep.subr.bf16.mxu1 %v241_v15  ;;  %v255_v38 = vpack.c.bf16 %v79_v35, %v77_v34  ;;  %v257_v39 = vpack.c.bf16 %v84_v37, %v82_v36  ;;  %v81_v40 = vld [vmem:[#allocation6 + $0xc0] sm:$0xff]  ;;  %v83_v41 = vld [vmem:[#allocation6 + $0xd0] sm:$0xff]  ;;  %v86_v42 = vld [vmem:[#allocation6 + $0xe8] sm:$0xff] }
  0x31   :  { %v88_v43 = vld [vmem:[#allocation6 + $0xf8] sm:$0xff]  ;;  %v259_v44 = vpack.c.bf16 %v83_v41, %v81_v40  ;;  %v85_v46 = vld [vmem:[#allocation6 + $0xe0] sm:$0xff]  ;;  %v87_v47 = vld [vmem:[#allocation6 + $0xf0] sm:$0xff] }
  0x32   :  { %v261_v45 = vpack.c.bf16 %v88_v43, %v86_v42  ;;  %v263_v48 = vpack.c.bf16 %v87_v47, %v85_v46  ;;  %v55_v49 = vld [vmem:[#allocation3] sm:$0xff]  ;;  %v56_v50 = vld [vmem:[#allocation3 + $0x8] sm:$0xff] }
  0x33   :  { %244 = vmatpush1.bf16.msra.mxu0 %v243_v20  ;;  %275 = vmatpush1.bf16.msra.mxu1 %v243_v20  ;;  %v181_v54 = vld [vmem:[%s444_s2] sm:$0x3]  ;;  %s376_s2 = smov [#allocation8]  }
  0x34   :  { %246 = vmatprep.subr.bf16.mxu0 %v245_v21  ;;  %268 = vmatprep.subr.bf16.mxu1 %v245_v21  ;;  %v190_v55 = vrot.slane %v181_v54, %v189_v53  ;;  %v186_v5 = vrot.slane %v181_v54, %v185_v4  ;;  %s218_s13 = sshll.u32 %s376_s2, 4  ;;  %s219_s13 = int_to_ptr.vmem [resolvable:$true] %s218_s13 }
  0x35   :  { %s341_s14 = scalar_lea.vmem %s219_s13, 256  ;;  %p346_p3 = scmp.lt.s32.totalorder %s219_s13, %s219_s13 }
  0x36   :  { %p342_p2 = scmp.ne.s32.totalorder %s219_s13, %s341_s14  ;;  %p347_p4 = scmp.lt.s32.totalorder %s341_s14, %s341_s14 }
  0x37   :  { %248 = vmatpush1.bf16.msra.mxu0 %v247_v26  ;;  %276 = vmatpush1.bf16.msra.mxu1 %v247_v26 }
  0x38   :  { %250 = vmatprep.subr.bf16.mxu0 %v249_v27  ;;  %269 = vmatprep.subr.bf16.mxu1 %v249_v27  ;;  %p348_p5 = por %p347_p4, %p346_p3 }
  0x3a   :  { %p349_p6 = pnand %p348_p5, %p342_p2 }
  0x3b   :  { %252 = vmatpush1.bf16.msra.mxu0 %v251_v32  ;;  %277 = vmatpush1.bf16.msra.mxu1 %v251_v32 }
  0x3c   :  { %254 = vmatprep.subr.bf16.mxu0 %v253_v33  ;;  %270 = vmatprep.subr.bf16.mxu1 %v253_v33 }
  0x3f   :  { %256 = vmatpush1.bf16.msra.mxu0 %v255_v38  ;;  %278 = vmatpush1.bf16.msra.mxu1 %v255_v38 }
  0x40   :  { %258 = vmatprep.subr.bf16.mxu0 %v257_v39  ;;  %271 = vmatprep.subr.bf16.mxu1 %v257_v39 }
  0x43   :  { %260 = vmatpush1.bf16.msra.mxu0 %v259_v44  ;;  %279 = vmatpush1.bf16.msra.mxu1 %v259_v44 }
  0x44   :  { %262 = vmatprep.subr.bf16.mxu0 %v261_v45  ;;  %272 = vmatprep.subr.bf16.mxu1 %v261_v45 }
  0x47   :  { %264 = vmatpush1.bf16.msra.mxu0 %v263_v48  ;;  %280 = vmatpush1.bf16.msra.mxu1 %v263_v48 }
  0x4a   :  { %154 = vmatmul.mubr.f32.vlgmr.msra.gmra.mrb[0].mxu0 %v55_v49  ;;  %160 = vmatmul.mubr.f32.vlgmr.msra.gmra.mrb[0].mxu1 %v56_v50 }
 0x11d   :  { %v155_v56 = vpop.f32.mrb[0].mxu0  ;;  %v161_v57 = vpop.f32.mrb[0].mxu1 }
 0x11e   :  { %v157_v58 = vpop.f32.mrb[1].mxu0  ;;  %v163_v59 = vpop.f32.mrb[1].mxu1  ;;  %v193_v6 = vadd.f32 %v186_v5, %v155_v56  ;;  %v195_v8 = vadd.f32 %v186_v5, %v161_v57 }
 0x11f   :  { %v194_v60 = vadd.f32 %v190_v55, %v157_v58  ;;  %v196_v61 = vadd.f32 %v190_v55, %v163_v59 }
 0x121   :  { %v231_v62 = vmul.f32 -1.442695, %v194_v60  ;;  %v232_v63 = vmul.f32 -1.442695, %v196_v61 }
 0x123   :  { %289 = vpow2.f32 %v231_v62 }
 0x124   :  { %291 = vpow2.f32 %v232_v63 }
 0x12d   :  { %v290_v0 = vpop.eup %289 }
 0x12e   :  { %v292_v1 = vpop.eup %291  ;;  %v203_v2 = vadd.f32 1.0, %v290_v0 }
 0x12f   :  { %v204_v3 = vadd.f32 1.0, %v292_v1 }
 0x130   :  { %293 = vrcp.f32 %v203_v2 }
 0x131   :  { %295 = vrcp.f32 %v204_v3 }
 0x13a   :  { %v294_v7 = vpop.eup %293 }
 0x13b   :  { %v296_v9 = vpop.eup %295  ;;  %v209_v10 = vmul.f32 %v294_v7, %v193_v6 }
 0x13c   :  { %v210_v11 = vmul.f32 %v296_v9, %v195_v8 }
 0x13d   :  { %211 = vst [vmem:[#allocation8] sm:$0xff] %v209_v10 }
 0x13e   :  { %212 = vst [vmem:[#allocation8 + $0x8] sm:$0xff] %v210_v11 }
 0x13f   :  { %352 = shalt.err (!%p349_p6)
}
 0x140   :  { %s353_s17 = scalar_lea.hbm %s445_s3, 256 }
 0x141   :  { %p354_p7 = scmp.ne.s32.totalorder %s445_s3, %s353_s17  ;;  %p357_p8 = scmp.lt.u32.totalorder %s353_s17, %s445_s3 }
 0x143   :  { %p359_p9 = pnand %p357_p8, %p354_p7 }
 0x145   :  { %362 = shalt.err (!%p359_p9)
}
 0x146   :  { %224 = dma.vmem_to_hbm [thread:$0]  %s219_s13, 256, %s445_s3, [#allocation5], %s370_s22, %s370_s22, %s371_s23  }
 0x147   :  { %367 = dma.done.wait [#allocation5], 256  }
 0x148   :  { %368 = vsyncadd [#allocation5], 4294967040 }
 0x149   :  { %228 = vsyncpa [#allocation4], 1 }
 0x14a   :  { %229 = vsyncpa [#allocation7], 1 }
 0x14b   :  { %230 = vsyncpa [#allocation5], 1 }

</bundles_post_ra>
